<compile_context>
chip_gen: v5e
topology: v5e:2x2
jax: 0.10.0
libtpu: 0.0.40
codegen_flags: <defaults>
</compile_context>

<pallas_src>
import jax
import jax.numpy as jnp
from jax.experimental import pallas as pl
from jax.experimental.pallas import tpu as pltpu


def _fused_mlp_kernel(x_ref, w1_ref, b1_ref, w2_ref, b2_ref, w3_ref, b3_ref,
                      o_ref):
    """Fused 3-layer MLP: (Linear+ReLU) x2 -> Linear, all in VMEM.

    x arrives in f32 and is cast to the weight dtype (bf16 on the fast path)
    in VMEM; accumulation is always f32, bias add and ReLU run in f32.
    """
    x = x_ref[...].astype(w1_ref.dtype)

    # hidden layer 1: Linear + ReLU
    h = jnp.dot(x, w1_ref[...], preferred_element_type=jnp.float32)
    h = jnp.maximum(h + b1_ref[...], 0.0)

    # hidden layer 2: Linear + ReLU
    h = jnp.dot(h.astype(w2_ref.dtype), w2_ref[...],
                preferred_element_type=jnp.float32)
    h = jnp.maximum(h + b2_ref[...], 0.0)

    # output layer: Linear (no activation, single head)
    o = jnp.dot(h.astype(w3_ref.dtype), w3_ref[...],
                preferred_element_type=jnp.float32)
    o_ref[...] = (o + b3_ref[...]).astype(o_ref.dtype)


def _round_up(n, m):
    return ((n + m - 1) // m) * m


def _choose_batch_tile(B, *, cap=4096, split_threshold=2048):
    """Pick a batch tile (multiple of 8 for the f32 sublane constraint).

    - B (rounded to 8) <= split_threshold: one tile, one grid step. On 1-TC
      v5e/v6e the grid is a serial loop, so splitting small B only adds the
      ~0.35us per-step overhead; on v7x small tiles can't amortize it either.
    - larger B: split so the per-TC tile stays <= cap; the 'parallel' batch
      axis then feeds both v7x TensorCores and the x-tile DMA overlaps compute.
    """
    bt = _round_up(max(B, 8), 8)
    if bt <= split_threshold:
        return bt
    return min(_round_up(-(-bt // 2), 8), cap)


def nn_forward(x, params, *, batch_tile=None):
    """Runs the NN forward pass as a single fused Pallas kernel.

    x:       (B, input_dim) float32
    params:  dict with w1,b1,w2,b2,w3,b3. Weights are (in, out) and determine
             the MXU matmul dtype (pass bf16 weights from prepare_params for
             the fast path, raw f32 weights for the exact path). Biases are
             (1, out) float32.
    """
    B, in_dim = x.shape
    w1, b1 = params["w1"], params["b1"]
    w2, b2 = params["w2"], params["b2"]
    w3, b3 = params["w3"], params["b3"]
    h1, h2, out_dim = w1.shape[1], w2.shape[1], w3.shape[1]

    if batch_tile is None:
        batch_tile = _choose_batch_tile(B)
    batch_tile = max(8, (batch_tile // 8) * 8)
    num_tiles = pl.cdiv(B, batch_tile)

    # Batch axis tiled across the grid (last block may be partial: its input
    # rows past B are garbage but the corresponding output stores are masked).
    # Weights/biases use a constant block index, so the pipeline keeps them
    # resident in VMEM and does not re-issue their DMA each grid step.
    in_specs = [
        pl.BlockSpec((batch_tile, in_dim), lambda i: (i, 0)),   # x tile (f32)
        pl.BlockSpec((in_dim, h1), lambda i: (0, 0)),           # W1
        pl.BlockSpec((1, h1), lambda i: (0, 0)),                # b1
        pl.BlockSpec((h1, h2), lambda i: (0, 0)),               # W2
        pl.BlockSpec((1, h2), lambda i: (0, 0)),                # b2
        pl.BlockSpec((h2, out_dim), lambda i: (0, 0)),          # W3
        pl.BlockSpec((1, out_dim), lambda i: (0, 0)),           # b3
    ]
    out_specs = pl.BlockSpec((batch_tile, out_dim), lambda i: (i, 0))

    return pl.pallas_call(
        _fused_mlp_kernel,
        out_shape=jax.ShapeDtypeStruct((B, out_dim), jnp.float32),
        grid_spec=pltpu.PrefetchScalarGridSpec(
            num_scalar_prefetch=0,
            grid=(num_tiles,),
            in_specs=in_specs,
            out_specs=out_specs,
        ),
        compiler_params=pltpu.CompilerParams(
            dimension_semantics=("parallel",)),
    )(x, w1, b1, w2, b2, w3, b3)


def prepare_params(params, *, use_bf16=True):
    """One-time cast of the weights to the MXU compute dtype (biases stay f32).

    Call once and reuse the result across nn_forward calls so no per-call
    astype ops / dispatches are issued (matters for small-batch RL inference).
    """
    if not use_bf16:
        return params
    out = dict(params)
    for n in ("w1", "w2", "w3"):
        out[n] = params[n].astype(jnp.bfloat16)
    return out


def init_params(key, input_dim, layers_info):
    """Deterministic init mimicking PyTorch nn.Linear default:
    U(-1/sqrt(fan_in), 1/sqrt(fan_in)) for both weight and bias."""
    dims = [input_dim] + list(layers_info)
    params = {}
    names = ["1", "2", "3"]
    for n, (fan_in, fan_out) in zip(names, zip(dims[:-1], dims[1:])):
        key, kw, kb = jax.random.split(key, 3)
        bound = 1.0 / jnp.sqrt(float(fan_in))
        # stored as (in, out) so the kernel does x @ W
        params["w" + n] = jax.random.uniform(
            kw, (fan_in, fan_out), jnp.float32, -bound, bound)
        params["b" + n] = jax.random.uniform(
            kb, (1, fan_out), jnp.float32, -bound, bound)
    return params


def reference_forward(x, p):
    """Pure-JAX f32 reference of NN.forward for the same instantiation."""
    h = jnp.maximum(x @ p["w1"] + p["b1"], 0.0)
    h = jnp.maximum(h @ p["w2"] + p["b2"], 0.0)
    return h @ p["w3"] + p["b3"]


if __name__ == "__main__":
    INPUT_DIM = 32
    LAYERS_INFO = [64, 64, 8]   # two hidden layers of 64, output head of 8

    key = jax.random.PRNGKey(0)
    key, kp = jax.random.split(key)
    params_f32 = init_params(kp, INPUT_DIM, LAYERS_INFO)
    params_bf16 = prepare_params(params_f32, use_bf16=True)   # cast once

    # bf16-matmul path (default): exercise tiny, non-tile-aligned and larger
    # batch shapes (all single-tile here; >2048 would split). Tolerance is
    # loosened vs the f32 reference because the MXU matmuls use bf16 inputs
    # (f32 accumulation).
    for batch in (2, 100, 256):
        key, kx = jax.random.split(key)
        x = jax.random.normal(kx, (batch, INPUT_DIM), jnp.float32)
        out = jax.block_until_ready(nn_forward(x, params_bf16))
        ref = reference_forward(x, params_f32)
        assert out.shape == (batch, LAYERS_INFO[-1])
        assert jnp.allclose(out, ref, atol=5e-2, rtol=5e-2), (
            "bf16 path mismatch vs f32 reference (batch=%d)" % batch)

    # exact f32 path (raw f32 weights) for tight agreement with the reference.
    key, kx = jax.random.split(key)
    x = jax.random.normal(kx, (64, INPUT_DIM), jnp.float32)
    out = jax.block_until_ready(nn_forward(x, params_f32))
    ref = reference_forward(x, params_f32)
    assert jnp.allclose(out, ref, atol=1e-5, rtol=1e-5), "f32 path mismatch"

    print("KERNEL_OK")
</pallas_src>

<mosaic_0001>
module attributes {stable_mosaic.version = 11 : i64} {
  func.func @_fused_mlp_kernel(%arg0: i32, %arg1: memref<8x32xf32, #tpu.memory_space<vmem>>, %arg2: memref<32x64xbf16, #tpu.memory_space<vmem>>, %arg3: memref<1x64xf32, #tpu.memory_space<vmem>>, %arg4: memref<64x64xbf16, #tpu.memory_space<vmem>>, %arg5: memref<1x64xf32, #tpu.memory_space<vmem>>, %arg6: memref<64x8xbf16, #tpu.memory_space<vmem>>, %arg7: memref<1x8xf32, #tpu.memory_space<vmem>>, %arg8: memref<8x8xf32, #tpu.memory_space<vmem>>) attributes {dimension_semantics = [#tpu.dimension_semantics<parallel>], iteration_bounds = array<i64: 1>, scalar_prefetch = 0 : i64, scratch_operands = 0 : i64, tpu.core_type = #tpu.core_type<tc>, window_params = [{transform_indices = @transform_0, window_bounds = array<i64: 8, 32>}, {pipeline_mode = #tpu.pipeline_mode<synchronous>, transform_indices = @transform_1, window_bounds = array<i64: 32, 64>}, {pipeline_mode = #tpu.pipeline_mode<synchronous>, transform_indices = @transform_2, window_bounds = array<i64: 1, 64>}, {pipeline_mode = #tpu.pipeline_mode<synchronous>, transform_indices = @transform_3, window_bounds = array<i64: 64, 64>}, {pipeline_mode = #tpu.pipeline_mode<synchronous>, transform_indices = @transform_4, window_bounds = array<i64: 1, 64>}, {pipeline_mode = #tpu.pipeline_mode<synchronous>, transform_indices = @transform_5, window_bounds = array<i64: 64, 8>}, {pipeline_mode = #tpu.pipeline_mode<synchronous>, transform_indices = @transform_6, window_bounds = array<i64: 1, 8>}, {transform_indices = @transform_7, window_bounds = array<i64: 8, 8>}]} {
    %c0 = arith.constant 0 : index
    %c0_0 = arith.constant 0 : index
    %0 = vector.load %arg1[%c0, %c0_0] : memref<8x32xf32, #tpu.memory_space<vmem>>, vector<8x32xf32>
    %1 = arith.truncf %0 : vector<8x32xf32> to vector<8x32xbf16>
    %c0_1 = arith.constant 0 : index
    %c0_2 = arith.constant 0 : index
    %2 = vector.load %arg2[%c0_1, %c0_2] : memref<32x64xbf16, #tpu.memory_space<vmem>>, vector<32x64xbf16>
    %cst = arith.constant dense<0.000000e+00> : vector<8x64xf32>
    %3 = tpu.matmul %1, %2, %cst {dimension_numbers = #tpu.dot_dimension_numbers<[1], [0], [0], [1], [0, 0, 1, 1], [], []>} : vector<8x32xbf16>, vector<32x64xbf16>, vector<8x64xf32> -> vector<8x64xf32>
    %c0_3 = arith.constant 0 : index
    %c0_4 = arith.constant 0 : index
    %4 = vector.load %arg3[%c0_3, %c0_4] : memref<1x64xf32, #tpu.memory_space<vmem>>, vector<1x64xf32>
    %5 = vector.broadcast %4 : vector<1x64xf32> to vector<8x64xf32>
    %6 = arith.addf %3, %5 : vector<8x64xf32>
    %cst_5 = arith.constant 0.000000e+00 : f32
    %7 = vector.broadcast %cst_5 : f32 to vector<8x64xf32>
    %8 = arith.maximumf %6, %7 : vector<8x64xf32>
    %9 = arith.truncf %8 : vector<8x64xf32> to vector<8x64xbf16>
    %c0_6 = arith.constant 0 : index
    %c0_7 = arith.constant 0 : index
    %10 = vector.load %arg4[%c0_6, %c0_7] : memref<64x64xbf16, #tpu.memory_space<vmem>>, vector<64x64xbf16>
    %cst_8 = arith.constant dense<0.000000e+00> : vector<8x64xf32>
    %11 = tpu.matmul %9, %10, %cst_8 {dimension_numbers = #tpu.dot_dimension_numbers<[1], [0], [0], [1], [0, 0, 1, 1], [], []>} : vector<8x64xbf16>, vector<64x64xbf16>, vector<8x64xf32> -> vector<8x64xf32>
    %c0_9 = arith.constant 0 : index
    %c0_10 = arith.constant 0 : index
    %12 = vector.load %arg5[%c0_9, %c0_10] : memref<1x64xf32, #tpu.memory_space<vmem>>, vector<1x64xf32>
    %13 = vector.broadcast %12 : vector<1x64xf32> to vector<8x64xf32>
    %14 = arith.addf %11, %13 : vector<8x64xf32>
    %cst_11 = arith.constant 0.000000e+00 : f32
    %15 = vector.broadcast %cst_11 : f32 to vector<8x64xf32>
    %16 = arith.maximumf %14, %15 : vector<8x64xf32>
    %17 = arith.truncf %16 : vector<8x64xf32> to vector<8x64xbf16>
    %c0_12 = arith.constant 0 : index
    %c0_13 = arith.constant 0 : index
    %18 = vector.load %arg6[%c0_12, %c0_13] : memref<64x8xbf16, #tpu.memory_space<vmem>>, vector<64x8xbf16>
    %cst_14 = arith.constant dense<0.000000e+00> : vector<8x8xf32>
    %19 = tpu.matmul %17, %18, %cst_14 {dimension_numbers = #tpu.dot_dimension_numbers<[1], [0], [0], [1], [0, 0, 1, 1], [], []>} : vector<8x64xbf16>, vector<64x8xbf16>, vector<8x8xf32> -> vector<8x8xf32>
    %c0_15 = arith.constant 0 : index
    %c0_16 = arith.constant 0 : index
    %20 = vector.load %arg7[%c0_15, %c0_16] : memref<1x8xf32, #tpu.memory_space<vmem>>, vector<1x8xf32>
    %21 = vector.broadcast %20 : vector<1x8xf32> to vector<8x8xf32>
    %22 = arith.addf %19, %21 : vector<8x8xf32>
    %c0_17 = arith.constant 0 : index
    %c0_18 = arith.constant 0 : index
    %23 = vector.load %arg8[%c0_17, %c0_18] : memref<8x8xf32, #tpu.memory_space<vmem>>, vector<8x8xf32>
    tpu.vector_store %arg8[%c0_17, %c0_18], %22 {strides = array<i32>} : memref<8x8xf32, #tpu.memory_space<vmem>>, vector<8x8xf32>,
    return
  }
  func.func @transform_0(%arg0: i32) -> (i32, i32) {
    %c0_i32 = arith.constant 0 : i32
    %c0_i32_0 = arith.constant 0 : i32
    return %arg0, %c0_i32 : i32, i32
  }
  func.func @transform_1(%arg0: i32) -> (i32, i32) {
    %c0_i32 = arith.constant 0 : i32
    %c0_i32_0 = arith.constant 0 : i32
    %c0_i32_1 = arith.constant 0 : i32
    return %c0_i32, %c0_i32_0 : i32, i32
  }
  func.func @transform_2(%arg0: i32) -> (i32, i32) {
    %c0_i32 = arith.constant 0 : i32
    %c0_i32_0 = arith.constant 0 : i32
    %c0_i32_1 = arith.constant 0 : i32
    return %c0_i32, %c0_i32_0 : i32, i32
  }
  func.func @transform_3(%arg0: i32) -> (i32, i32) {
    %c0_i32 = arith.constant 0 : i32
    %c0_i32_0 = arith.constant 0 : i32
    %c0_i32_1 = arith.constant 0 : i32
    return %c0_i32, %c0_i32_0 : i32, i32
  }
  func.func @transform_4(%arg0: i32) -> (i32, i32) {
    %c0_i32 = arith.constant 0 : i32
    %c0_i32_0 = arith.constant 0 : i32
    %c0_i32_1 = arith.constant 0 : i32
    return %c0_i32, %c0_i32_0 : i32, i32
  }
  func.func @transform_5(%arg0: i32) -> (i32, i32) {
    %c0_i32 = arith.constant 0 : i32
    %c0_i32_0 = arith.constant 0 : i32
    %c0_i32_1 = arith.constant 0 : i32
    return %c0_i32, %c0_i32_0 : i32, i32
  }
  func.func @transform_6(%arg0: i32) -> (i32, i32) {
    %c0_i32 = arith.constant 0 : i32
    %c0_i32_0 = arith.constant 0 : i32
    %c0_i32_1 = arith.constant 0 : i32
    return %c0_i32, %c0_i32_0 : i32, i32
  }
  func.func @transform_7(%arg0: i32) -> (i32, i32) {
    %c0_i32 = arith.constant 0 : i32
    %c0_i32_0 = arith.constant 0 : i32
    return %arg0, %c0_i32 : i32, i32
  }
}

</mosaic_0001>

<bundles_post_ra>
// kernel: tpu_custom_call.1
= control target key start
LH: loop header
LB: loop body
LE: loop exit
PB: predicated region body
PF: predicated region fallthrough
CT: control target
= control target key end

     0   :  { %12 = vsyncpa [#allocation3], 0  ;;  %s415_s0 = inlined_call_operand.vmem [shape: f32[2,32], index: 0, kind: input, shape index: {}]   ;;  %s416_s1 = inlined_call_operand.hbm [shape: bf16[32,64], index: 1, kind: input, shape index: {}]   ;;  %s417_s2 = inlined_call_operand.vmem [shape: f32[1,64], index: 2, kind: input, shape index: {}]   ;;  %s418_s3 = inlined_call_operand.vmem [shape: bf16[64,64], index: 3, kind: input, shape index: {}]   ;;  %s419_s4 = inlined_call_operand.vmem [shape: f32[1,64], index: 4, kind: input, shape index: {}]   ;;  %s420_s5 = inlined_call_operand.vmem [shape: bf16[64,8], index: 5, kind: input, shape index: {}]   ;;  %s421_s6 = inlined_call_operand.vmem [shape: f32[1,8], index: 6, kind: input, shape index: {}]   ;;  %s422_s7 = inlined_call_operand.hbm [shape: f32[2,8], index: 7, kind: output, shape index: {}]  }
   0x1   :  { %13 = vsyncpa [#allocation4], 0  ;;  %s20_s26 = sshll.u32 %s416_s1, 4  ;;  %s327_s27 = smov [#allocation2]   ;;  %s21_s26 = int_to_ptr.hbm [resolvable:$true] %s20_s26 }
   0x2   :  { %s22_s28 = sshll.u32 %s327_s27, 4  ;;  %s328_s29 = smov 64   ;;  %s23_s28 = int_to_ptr.vmem [resolvable:$true] %s22_s28 }
   0x3   :  { %s329_s30 = smov 4  }
   0x4   :  { %28 = dma.hbm_to_vmem [thread:$0]  %s21_s26, 256, %s23_s28, [#allocation3], %s328_s29, %s328_s29, %s329_s30  }
   0x5   :  { %323 = dma.done.wait [#allocation3], 256  }
   0x6   :  { %324 = vsyncadd [#allocation3], 4294967040  ;;  %v257_v0 = vld [vmem:[#allocation2 + $0x8] sm:$0xff]  ;;  %v256_v1 = vld [vmem:[#allocation2] sm:$0xff]  ;;  %vm66_vm0 = vcmask 261120   ;;  %vm121_vm1 = vcmask 523264  }
   0x7   :  { %v261_v2 = vld [vmem:[%s418_s3 + $0x18] sm:$0xff]  ;;  %76 = vmatpush.bf16.msra.mxu0 %v257_v0  ;;  %v44_v3 = vld [vmem:[%s415_s0] sm:$0xff]  ;;  %v260_v4 = vld [vmem:[%s418_s3 + $0x10] sm:$0xff]  ;;  %vm192_vm2 = vcmask 64512  }
   0x8   :  { %129 = vmatpush.bf16.msra.mxu1 %v261_v2  ;;  %v45_v5 = vpack.c.bf16 %v44_v3, %v44_v3  ;;  %v259_v6 = vld [vmem:[%s418_s3 + $0x8] sm:$0xff]  ;;  %v258_v7 = vld [vmem:[%s418_s3] sm:$0xff]  ;;  %v265_v8 = vld [vmem:[%s420_s5 + $0x18] sm:$0xff] }
   0x9   :  { %183 = vmatpush.bf16.msra.mxu2 %v265_v8  ;;  %v264_v9 = vld [vmem:[%s420_s5 + $0x10] sm:$0xff]  ;;  %v272_v10 = vld [vmem:[%s417_s2] ss:$0 sm:$0xff]  ;;  %v263_v16 = vld [vmem:[%s420_s5 + $0x8] sm:$0xff] }
   0xa   :  { %v262_v17 = vld [vmem:[%s420_s5] sm:$0xff] }
   0xb   :  { %77 = vmatpush.bf16.msra.mxu0 %v256_v1  ;;  %v273_v18 = vld [vmem:[%s419_s4] ss:$0 sm:$0xff] }
   0xc   :  { %130 = vmatpush.bf16.msra.mxu1 %v260_v4  ;;  %v274_v24 = vld [vmem:[%s421_s6] ss:$0 sm:$0xff] }
   0xd   :  { %184 = vmatpush.bf16.msra.mxu2 %v264_v9 }
   0xe   :  { %221 = vmatmul.msk.bf16.vlgmr.msra.gmra.mxu0 %vm66_vm0, %v45_v5 }
  0x10   :  { %131 = vmatpush.bf16.msra.mxu1 %v259_v6 }
  0x11   :  { %185 = vmatpush.bf16.msra.mxu2 %v263_v16 }
  0x14   :  { %132 = vmatpush.bf16.msra.mxu1 %v258_v7 }
  0x15   :  { %186 = vmatpush.bf16.msra.mxu2 %v262_v17 }
  0x8b   :  { %v79_v11 = vpop.f32.mrf.mxu0 }
  0x8c   :  { %v80_v12 = vadd.f32 %v272_v10, %v79_v11 }
  0x8e   :  { %v83_v13 = vmax.f32 %v80_v12, 0.0 }
  0x90   :  { %v84_v14 = vpack.c.bf16 %v83_v13, %v83_v13 }
  0x92   :  { %238 = vmatmul.msk.bf16.vlgmr.msra.gmra.mxu1 %vm121_vm1, %v84_v14 }
  0x93   :  { %v81_v15 = vpop.f32.mrf.mxu0 }
 0x10f   :  { %v134_v19 = vpop.f32.mrf.mxu1 }
 0x110   :  { %v135_v20 = vadd.f32 %v273_v18, %v134_v19 }
 0x112   :  { %v138_v21 = vmax.f32 %v135_v20, 0.0 }
 0x114   :  { %v139_v22 = vpack.c.bf16 %v138_v21, %v138_v21 }
 0x116   :  { %255 = vmatmul.msk.bf16.vlgmr.msra.gmra.mxu2 %vm121_vm1, %v139_v22 }
 0x117   :  { %v136_v23 = vpop.f32.mrf.mxu1 }
 0x199   :  { %v188_v25 = vpop.f32.mrf.mxu2 }
 0x19a   :  { %v189_v26 = vadd.f32 %v274_v24, %v188_v25 }
 0x19c   :  { %193 = vst.msk [vmem:[#allocation5] sm:$0xff] %vm192_vm2, %v189_v26 }
 0x1a1   :  { %v190_v27 = vpop.f32.mrf.mxu2 }
 0x1a2   :  { %197 = vsyncadd [#allocation4], 96  ;;  %s200_s4 = sshll.u32 %s422_s7, 4  ;;  %s330_s29 = smov [#allocation5]   ;;  %s201_s4 = int_to_ptr.hbm [resolvable:$true] %s200_s4 }
 0x1a3   :  { %s198_s30 = sshll.u32 %s330_s29, 4  ;;  %s331_s8 = smov 32   ;;  %s199_s30 = int_to_ptr.vmem [resolvable:$true] %s198_s30 }
 0x1a4   :  { %s332_s9 = smov 2  }
 0x1a5   :  { %206 = dma.vmem_to_hbm [thread:$0]  %s199_s30, 32, %s201_s4, [#allocation4], %s331_s8, %s331_s8, %s332_s9  }
 0x1a6   :  { %325 = dma.done.wait [#allocation4], 128  }
 0x1a7   :  { %326 = vsyncadd [#allocation4], 4294967168 }
 0x1a8   :  { %211 = vsyncpa [#allocation3], 1 }
 0x1a9   :  { %212 = vsyncpa [#allocation4], 1 }

</bundles_post_ra>
